<compile_context>
chip_gen: v6e
topology: v6e:2x2x1
jax: 0.10.0
libtpu: 0.0.40
codegen_flags: <defaults>
</compile_context>

<pallas_src>
import math
import functools

import jax
import jax.numpy as jnp
import numpy as np
from jax.experimental import pallas as pl
from jax.experimental.pallas import tpu as pltpu


_MASK_VALUE = -0.7 * float(np.finfo(np.float32).max)   # finite "minus inf"


def _pick_tile(dim, pref, mult=8):
    """Largest exact divisor of `dim` <= pref, preferring multiples of `mult`."""
    pref = min(pref, dim)
    best_any = None
    for t in range(pref, 0, -1):
        if dim % t == 0:
            if best_any is None:
                best_any = t
            if t % mult == 0:
                return t
    return best_any if best_any is not None else dim


def _compiler_params(semantics):
    kwargs = dict(dimension_semantics=semantics)
    try:
        cap = pltpu.get_tpu_info().vmem_capacity_bytes
        kwargs["vmem_limit_bytes"] = int(cap * 3 // 4)   # ~25% headroom
    except Exception:
        pass  # fall back to the compiler default scoped limit
    return pltpu.CompilerParams(**kwargs)


# ---------------------------------------------------------------------------
# Tiled linear projection: y = x @ W.T   (nn.Linear, bias=False)
#   x: (M, K) bf16, W: (N, K) bf16  ->  y: (M, N)
# Weights consumed in their native (N, K) layout (no transpose copy).
# ---------------------------------------------------------------------------
def _linear_kernel(x_ref, w_ref, o_ref, acc_ref):
    @pl.when(pl.program_id(2) == 0)
    def _():
        acc_ref[...] = jnp.zeros_like(acc_ref)

    acc_ref[...] += jax.lax.dot_general(
        x_ref[...], w_ref[...], (((1,), (1,)), ((), ())),
        preferred_element_type=jnp.float32)

    @pl.when(pl.program_id(2) == pl.num_programs(2) - 1)
    def _():
        o_ref[...] = acc_ref[...].astype(o_ref.dtype)


def linear(x2d, w, *, out_dtype=None, tm=256, tn=256, tk=512):
    M, K = x2d.shape
    N, K2 = w.shape
    assert K == K2
    tm = _pick_tile(M, tm, mult=8)
    tn = _pick_tile(N, tn, mult=128)
    tk = _pick_tile(K, tk, mult=128)
    out_dtype = out_dtype if out_dtype is not None else x2d.dtype
    return pl.pallas_call(
        _linear_kernel,
        grid=(M // tm, N // tn, K // tk),
        in_specs=[
            pl.BlockSpec((tm, tk), lambda i, j, k: (i, k)),
            pl.BlockSpec((tn, tk), lambda i, j, k: (j, k)),
        ],
        out_specs=pl.BlockSpec((tm, tn), lambda i, j, k: (i, j)),
        out_shape=jax.ShapeDtypeStruct((M, N), out_dtype),
        scratch_shapes=[pltpu.VMEM((tm, tn), jnp.float32)],
        compiler_params=_compiler_params(("parallel", "parallel", "arbitrary")),
    )(x2d, w)


# ---------------------------------------------------------------------------
# RoPE kernel on the flat (B*S, n_heads*D) layout (used once per KV head).
# rotate_half(x)*sin == pltpu.roll(x, D/2) * sin_rot with the sign folded in.
# ---------------------------------------------------------------------------
def _rope_kernel(x_ref, cos_ref, sinr_ref, o_ref):
    x = x_ref[...]                                    # (t, D)
    d2 = x.shape[1] // 2
    rot = pltpu.roll(x, shift=d2, axis=1)
    o_ref[...] = (x * cos_ref[...] + rot * sinr_ref[...]).astype(o_ref.dtype)


def apply_rope_2d(x2d, cos, sin_rot, *, n_heads, seq_len, out_dtype, tile=256):
    """x2d: (B*S, n_heads*D); cos/sin_rot: (S, D)."""
    M, HD = x2d.shape
    D = cos.shape[1]
    B = M // seq_len
    t = _pick_tile(seq_len, tile, mult=8)
    s_blocks = seq_len // t

    def x_map(r, i):
        return ((r // n_heads) * s_blocks + i, r % n_heads)

    return pl.pallas_call(
        _rope_kernel,
        grid=(B * n_heads, s_blocks),
        in_specs=[
            pl.BlockSpec((t, D), x_map),
            pl.BlockSpec((t, D), lambda r, i: (i, 0)),
            pl.BlockSpec((t, D), lambda r, i: (i, 0)),
        ],
        out_specs=pl.BlockSpec((t, D), x_map),
        out_shape=jax.ShapeDtypeStruct((M, HD), out_dtype),
        compiler_params=_compiler_params(("parallel", "parallel")),
    )(x2d, cos, sin_rot)


# ---------------------------------------------------------------------------
# Flash-style streaming attention (used when S <= heavy_const: heavy-hitter
# selection is a trace-time no-op).  Q RoPE (scale folded into tables) once
# per q tile; K/V streamed in (tkv, D) chunks; online softmax with deferred
# normalization; non-causal chunks skipped.
# ---------------------------------------------------------------------------
def _flash_attn_kernel(q_ref, k_ref, v_ref, cosq_ref, sinq_ref, o_ref,
                       m_sc, l_sc, acc_sc, qr_sc, *, compute_dtype):
    qi = pl.program_id(2)
    kv = pl.program_id(3)

    @pl.when(kv == 0)
    def _():
        m_sc[...] = jnp.full_like(m_sc, -jnp.inf)
        l_sc[...] = jnp.zeros_like(l_sc)
        acc_sc[...] = jnp.zeros_like(acc_sc)
        q = q_ref[...]                                 # (tq, D)
        d2 = q.shape[1] // 2
        # Q RoPE once per q tile; 1/sqrt(head_dim) already folded into tables.
        qr_sc[...] = (q * cosq_ref[...] +
                      pltpu.roll(q, shift=d2, axis=1) * sinq_ref[...]
                      ).astype(compute_dtype)

    # Causality: this kv chunk contributes only when kv <= qi (tq == tkv).
    @pl.when(kv <= qi)
    def _():
        s = jax.lax.dot_general(
            qr_sc[...], k_ref[...], (((1,), (1,)), ((), ())),
            preferred_element_type=jnp.float32)        # (tq, tkv) f32
        tq, tkv = s.shape
        row = qi * tq + jax.lax.broadcasted_iota(jnp.int32, s.shape, 0)
        col = kv * tkv + jax.lax.broadcasted_iota(jnp.int32, s.shape, 1)
        s = jnp.where(col <= row, s, _MASK_VALUE)

        m_prev = m_sc[...]
        m_new = jnp.maximum(m_prev, jnp.max(s, axis=-1, keepdims=True))
        alpha = jnp.exp(m_prev - m_new)
        p = jnp.exp(s - m_new)
        l_sc[...] = alpha * l_sc[...] + jnp.sum(p, axis=-1, keepdims=True)
        acc_sc[...] = alpha * acc_sc[...] + jax.lax.dot_general(
            p.astype(compute_dtype), v_ref[...], (((1,), (0,)), ((), ())),
            preferred_element_type=jnp.float32)
        m_sc[...] = m_new

    # Deferred normalization: one (tq, D) scale at the last needed chunk.
    @pl.when(kv == qi)
    def _():
        o_ref[...] = (acc_sc[...] *
                      pl.reciprocal(l_sc[...], approx=True)).astype(o_ref.dtype)


# ---------------------------------------------------------------------------
# Full-KV-row attention with the heavy-hitter top-k mask (S > heavy_const).
# Full-row residency is required by the per-row top-k semantics.
# ---------------------------------------------------------------------------
def _attn_topk_kernel(q_ref, k_ref, v_ref, cosq_ref, sinq_ref, o_ref,
                      *, heavy_const, compute_dtype):
    q = q_ref[...]                                     # (tq, D)
    d2 = q.shape[1] // 2
    qr = (q * cosq_ref[...] +
          pltpu.roll(q, shift=d2, axis=1) * sinq_ref[...]).astype(compute_dtype)
    s = jax.lax.dot_general(qr, k_ref[...], (((1,), (1,)), ((), ())),
                            preferred_element_type=jnp.float32)   # (tq, S)
    tq, kv_len = s.shape
    row = pl.program_id(2) * tq + jax.lax.broadcasted_iota(jnp.int32, s.shape, 0)
    col = jax.lax.broadcasted_iota(jnp.int32, s.shape, 1)
    s = jnp.where(col <= row, s, _MASK_VALUE)

    # Heavy-hitter keep mask: with group_factor == 1 the grouped weights equal
    # the (post-mask) scores, so keep the per-row top `heavy_const` entries.
    # TODO(synk): replace lax.top_k with an in-kernel bisection threshold when
    # this path is hot; ties at the k-th value keep all tied entries whereas
    # torch's sort keeps exactly heavy_const.
    kth = jax.lax.top_k(s, heavy_const)[0][:, heavy_const - 1:heavy_const]
    s = jnp.where(s >= kth, s, _MASK_VALUE)

    m = jnp.max(s, axis=-1, keepdims=True)
    e = jnp.exp(s - m)
    denom = jnp.sum(e, axis=-1, keepdims=True)
    out = jax.lax.dot_general(e.astype(compute_dtype), v_ref[...],
                              (((1,), (0,)), ((), ())),
                              preferred_element_type=jnp.float32)
    # Deferred normalization: scale the (tq, D) result, not the (tq, S) panel.
    o_ref[...] = (out * pl.reciprocal(denom, approx=True)).astype(o_ref.dtype)


def fused_attention(q2d, k2d, v2d, cos_q, sin_q, *, batch, seq_len, num_heads,
                    num_kv_heads, heavy_const, compute_dtype=jnp.bfloat16,
                    q_tile=256):
    """q2d: (B*S, H*D); k2d, v2d: (B*S, KVH*D) (k already RoPE'd).
    Returns attention output directly in the (B*S, H*D) layout."""
    B, S, H, KVH = batch, seq_len, num_heads, num_kv_heads
    groups = H // KVH
    D = cos_q.shape[1]
    tq = _pick_tile(S, q_tile, mult=8)
    qb = S // tq
    out_shape = jax.ShapeDtypeStruct((B * S, H * D), compute_dtype)

    if S <= heavy_const:
        # Streaming flash kernel; kv-chunk axis innermost ("arbitrary").
        tkv = tq
        kvb = S // tkv

        def q_map(r, g, qi, kv):
            return ((r // KVH) * qb + qi, (r % KVH) * groups + g)

        def kv_map(r, g, qi, kv):
            return ((r // KVH) * kvb + kv, r % KVH)

        def cos_map(r, g, qi, kv):
            return (qi, 0)

        kern = functools.partial(_flash_attn_kernel, compute_dtype=compute_dtype)
        return pl.pallas_call(
            kern,
            grid=(B * KVH, groups, qb, kvb),
            in_specs=[
                pl.BlockSpec((tq, D), q_map),
                pl.BlockSpec((tkv, D), kv_map),
                pl.BlockSpec((tkv, D), kv_map),
                pl.BlockSpec((tq, D), cos_map),
                pl.BlockSpec((tq, D), cos_map),
            ],
            out_specs=pl.BlockSpec((tq, D), q_map),
            out_shape=out_shape,
            scratch_shapes=[
                pltpu.VMEM((tq, 1), jnp.float32),        # m
                pltpu.VMEM((tq, 1), jnp.float32),        # l
                pltpu.VMEM((tq, D), jnp.float32),        # acc
                pltpu.VMEM((tq, D), compute_dtype),      # rotated Q
            ],
            compiler_params=_compiler_params(
                ("parallel", "parallel", "parallel", "arbitrary")),
        )(q2d, k2d, v2d, cos_q, sin_q)

    # Heavy-hitter path: whole KV row resident per (batch, kv-head).
    def q_map3(r, g, qi):
        return ((r // KVH) * qb + qi, (r % KVH) * groups + g)

    def kv_map3(r, g, qi):
        return (r // KVH, r % KVH)

    def cos_map3(r, g, qi):
        return (qi, 0)

    kern = functools.partial(_attn_topk_kernel, heavy_const=heavy_const,
                             compute_dtype=compute_dtype)
    return pl.pallas_call(
        kern,
        grid=(B * KVH, groups, qb),
        in_specs=[
            pl.BlockSpec((tq, D), q_map3),
            pl.BlockSpec((S, D), kv_map3),
            pl.BlockSpec((S, D), kv_map3),
            pl.BlockSpec((tq, D), cos_map3),
            pl.BlockSpec((tq, D), cos_map3),
        ],
        out_specs=pl.BlockSpec((tq, D), q_map3),
        out_shape=out_shape,
        compiler_params=_compiler_params(("parallel", "parallel", "parallel")),
    )(q2d, k2d, v2d, cos_q, sin_q)


# ---------------------------------------------------------------------------
# Full forward pass
# ---------------------------------------------------------------------------
def rotary_tables(seq_len, head_dim, rope_theta):
    inv_freq = 1.0 / (rope_theta ** (jnp.arange(0, head_dim, 2, dtype=jnp.float32)
                                     / head_dim))
    t = jnp.arange(seq_len, dtype=jnp.float32)
    freqs = jnp.einsum("s,d->sd", t, inv_freq)
    emb = jnp.concatenate([freqs, freqs], axis=-1)        # (S, D)
    return jnp.cos(emb), jnp.sin(emb)


def llama_attention_offloading(hidden_states, params, *, num_heads,
                               num_kv_heads, rope_theta=10000.0,
                               heavy_const=2048,
                               compute_dtype=jnp.bfloat16):
    # Standard HF causal attention mask is generated inside the kernel.
    # TODO(synk): arbitrary (non-causal) additive attention_mask, past_key_value
    # / use_cache, sorted_channel / pseudo_quantize (label_bits<16),
    # upper_layer_embedding and pretraining_tp>1 branches are dead at the
    # module's default config and are not implemented.
    B, S, hidden = hidden_states.shape
    D = hidden // num_heads

    # Pre-cast activations and weights to bf16 ONCE (halves every DMA);
    # matmuls accumulate in f32 so numerics are unchanged vs in-kernel casts.
    x2d = hidden_states.reshape(B * S, hidden).astype(compute_dtype)
    wq = params["q_proj"].astype(compute_dtype)
    wk = params["k_proj"].astype(compute_dtype)
    wv = params["v_proj"].astype(compute_dtype)
    wo = params["o_proj"].astype(compute_dtype)

    # Projections stay in the natural (B*S, heads*D) layout; per-head views are
    # expressed via BlockSpec index_maps (no reshape/transpose HBM copies).
    q2d = linear(x2d, wq, out_dtype=compute_dtype)
    k2d = linear(x2d, wk, out_dtype=compute_dtype)
    v2d = linear(x2d, wv, out_dtype=compute_dtype)

    cos, sin = rotary_tables(S, D, rope_theta)             # position_ids=arange(S)
    d2 = D // 2
    sin_rot = jnp.concatenate([-sin[:, :d2], sin[:, d2:]], axis=-1)  # sign folded
    scale = 1.0 / math.sqrt(D)
    cos_q = cos * scale                                     # fold 1/sqrt(D) into Q
    sin_q = sin_rot * scale

    # RoPE on K once per kv head (Q RoPE happens inside the attention kernel).
    k2d = apply_rope_2d(k2d, cos, sin_rot, n_heads=num_kv_heads, seq_len=S,
                        out_dtype=compute_dtype)

    attn2d = fused_attention(q2d, k2d, v2d, cos_q, sin_q,
                             batch=B, seq_len=S, num_heads=num_heads,
                             num_kv_heads=num_kv_heads, heavy_const=heavy_const,
                             compute_dtype=compute_dtype)   # (B*S, hidden)

    out = linear(attn2d, wo, out_dtype=hidden_states.dtype)
    return out.reshape(B, S, hidden)


# ---------------------------------------------------------------------------
# Pure-JAX f32 reference (mirrors the PyTorch forward at default config,
# standard causal mask)
# ---------------------------------------------------------------------------
def reference_forward(hidden_states, params, *, num_heads, num_kv_heads,
                      rope_theta=10000.0):
    B, S, hidden = hidden_states.shape
    D = hidden // num_heads
    groups = num_heads // num_kv_heads
    x2d = hidden_states.reshape(B * S, hidden)
    q = (x2d @ params["q_proj"].T).reshape(B, S, num_heads, D).transpose(0, 2, 1, 3)
    k = (x2d @ params["k_proj"].T).reshape(B, S, num_kv_heads, D).transpose(0, 2, 1, 3)
    v = (x2d @ params["v_proj"].T).reshape(B, S, num_kv_heads, D).transpose(0, 2, 1, 3)
    cos, sin = rotary_tables(S, D, rope_theta)

    def rope(x):
        d2 = D // 2
        rot = jnp.concatenate([-x[..., d2:], x[..., :d2]], axis=-1)
        return x * cos[None, None] + rot * sin[None, None]

    q, k = rope(q), rope(k)
    k = jnp.repeat(k, groups, axis=1)
    v = jnp.repeat(v, groups, axis=1)
    scores = jnp.einsum("bhqd,bhkd->bhqk", q, k) / math.sqrt(D)
    neg = jnp.finfo(jnp.float32).min
    causal = jnp.triu(jnp.full((S, S), neg, jnp.float32), k=1)
    scores = scores + causal[None, None]
    # heavy_const >= kv_len at these shapes -> heavy-hitter mask is a no-op
    p = jax.nn.softmax(scores.astype(jnp.float32), axis=-1)
    attn = jnp.einsum("bhqk,bhkd->bhqd", p, v)
    attn = attn.transpose(0, 2, 1, 3).reshape(B * S, hidden)
    return (attn @ params["o_proj"].T).reshape(B, S, hidden)


# ---------------------------------------------------------------------------
if __name__ == "__main__":
    # Small shapes, but with a realistic (lane-friendly) head_dim of 128.
    B, S, H, KVH, D = 2, 16, 4, 2, 128
    hidden = H * D  # 512

    key = jax.random.PRNGKey(0)
    kx, kq, kk, kv, ko = jax.random.split(key, 5)
    x = jax.random.normal(kx, (B, S, hidden), jnp.float32)
    params = {
        "q_proj": 0.02 * jax.random.normal(kq, (H * D, hidden), jnp.float32),
        "k_proj": 0.02 * jax.random.normal(kk, (KVH * D, hidden), jnp.float32),
        "v_proj": 0.02 * jax.random.normal(kv, (KVH * D, hidden), jnp.float32),
        "o_proj": 0.02 * jax.random.normal(ko, (hidden, hidden), jnp.float32),
    }

    out = llama_attention_offloading(
        x, params, num_heads=H, num_kv_heads=KVH,
        rope_theta=10000.0, heavy_const=2048)
    jax.block_until_ready(out)

    ref = reference_forward(x, params, num_heads=H, num_kv_heads=KVH,
                            rope_theta=10000.0)
    np.testing.assert_allclose(np.asarray(out), np.asarray(ref),
                               rtol=2e-2, atol=2e-2)
    print("KERNEL_OK")
</pallas_src>

<mosaic_0001>
module attributes {stable_mosaic.version = 11 : i64} {
  func.func @_linear_kernel(%arg0: i32, %arg1: i32, %arg2: i32, %arg3: memref<32x512xbf16, #tpu.memory_space<vmem>>, %arg4: memref<256x512xbf16, #tpu.memory_space<vmem>>, %arg5: memref<32x256xbf16, #tpu.memory_space<vmem>>, %arg6: memref<32x256xf32, #tpu.memory_space<vmem>>) attributes {dimension_semantics = [#tpu.dimension_semantics<parallel>, #tpu.dimension_semantics<parallel>, #tpu.dimension_semantics<arbitrary>], iteration_bounds = array<i64: 1, 2, 1>, scalar_prefetch = 0 : i64, scratch_operands = 1 : i64, tpu.core_type = #tpu.core_type<tc>, window_params = [{transform_indices = @transform_0, window_bounds = array<i64: 32, 512>}, {transform_indices = @transform_1, window_bounds = array<i64: 256, 512>}, {transform_indices = @transform_2, window_bounds = array<i64: 32, 256>}]} {
    %c0_i32 = arith.constant 0 : i32
    %0 = arith.cmpi eq, %arg2, %c0_i32 : i32
    %1 = arith.extui %0 : i1 to i32
    %c0_i32_0 = arith.constant 0 : i32
    %2 = arith.cmpi ne, %1, %c0_i32_0 : i32
    scf.if %2 {
      %cst_10 = arith.constant 0.000000e+00 : f32
      %12 = vector.broadcast %cst_10 : f32 to vector<32x256xf32>
      %c0_11 = arith.constant 0 : index
      %c0_12 = arith.constant 0 : index
      %13 = vector.load %arg6[%c0_11, %c0_12] : memref<32x256xf32, #tpu.memory_space<vmem>>, vector<32x256xf32>
      tpu.vector_store %arg6[%c0_11, %c0_12], %12 {strides = array<i32>} : memref<32x256xf32, #tpu.memory_space<vmem>>, vector<32x256xf32>,
    } else {
    }
    %c0 = arith.constant 0 : index
    %c0_1 = arith.constant 0 : index
    %3 = vector.load %arg6[%c0, %c0_1] : memref<32x256xf32, #tpu.memory_space<vmem>>, vector<32x256xf32>
    %c0_2 = arith.constant 0 : index
    %c0_3 = arith.constant 0 : index
    %4 = vector.load %arg3[%c0_2, %c0_3] : memref<32x512xbf16, #tpu.memory_space<vmem>>, vector<32x512xbf16>
    %c0_4 = arith.constant 0 : index
    %c0_5 = arith.constant 0 : index
    %5 = vector.load %arg4[%c0_4, %c0_5] : memref<256x512xbf16, #tpu.memory_space<vmem>>, vector<256x512xbf16>
    %cst = arith.constant dense<0.000000e+00> : vector<32x256xf32>
    %6 = tpu.matmul %4, %5, %cst {dimension_numbers = #tpu.dot_dimension_numbers<[1], [1], [0], [0], [0, 0, 1, 0], [], []>} : vector<32x512xbf16>, vector<256x512xbf16>, vector<32x256xf32> -> vector<32x256xf32>
    %7 = arith.addf %3, %6 : vector<32x256xf32>
    %c0_6 = arith.constant 0 : index
    %c0_7 = arith.constant 0 : index
    %8 = vector.load %arg6[%c0_6, %c0_7] : memref<32x256xf32, #tpu.memory_space<vmem>>, vector<32x256xf32>
    tpu.vector_store %arg6[%c0_6, %c0_7], %7 {strides = array<i32>} : memref<32x256xf32, #tpu.memory_space<vmem>>, vector<32x256xf32>,
    %c0_i32_8 = arith.constant 0 : i32
    %9 = arith.cmpi eq, %arg2, %c0_i32_8 : i32
    %10 = arith.extui %9 : i1 to i32
    %c0_i32_9 = arith.constant 0 : i32
    %11 = arith.cmpi ne, %10, %c0_i32_9 : i32
    scf.if %11 {
      %c0_10 = arith.constant 0 : index
      %c0_11 = arith.constant 0 : index
      %12 = vector.load %arg6[%c0_10, %c0_11] : memref<32x256xf32, #tpu.memory_space<vmem>>, vector<32x256xf32>
      %13 = arith.truncf %12 : vector<32x256xf32> to vector<32x256xbf16>
      %c0_12 = arith.constant 0 : index
      %c0_13 = arith.constant 0 : index
      %14 = vector.load %arg5[%c0_12, %c0_13] : memref<32x256xbf16, #tpu.memory_space<vmem>>, vector<32x256xbf16>
      tpu.vector_store %arg5[%c0_12, %c0_13], %13 {strides = array<i32>} : memref<32x256xbf16, #tpu.memory_space<vmem>>, vector<32x256xbf16>,
    } else {
    }
    return
  }
  func.func @transform_0(%arg0: i32, %arg1: i32, %arg2: i32) -> (i32, i32) {
    %c0_i32 = arith.constant 0 : i32
    return %arg0, %arg2 : i32, i32
  }
  func.func @transform_1(%arg0: i32, %arg1: i32, %arg2: i32) -> (i32, i32) {
    %c0_i32 = arith.constant 0 : i32
    return %arg1, %arg2 : i32, i32
  }
  func.func @transform_2(%arg0: i32, %arg1: i32, %arg2: i32) -> (i32, i32) {
    %c0_i32 = arith.constant 0 : i32
    return %arg0, %arg1 : i32, i32
  }
}

</mosaic_0001>

<bundles_post_ra>
// kernel: tpu_custom_call.1
= control target key start
LH: loop header
LB: loop body
LE: loop exit
PB: predicated region body
PF: predicated region fallthrough
CT: control target
= control target key end

     0   :  { %7 = vsyncpa [#allocation4], 0  ;;  %s1663_s0 = inlined_call_operand.hbm [shape: bf16[32,512], index: 0, kind: input, shape index: {}]   ;;  %s1664_s1 = inlined_call_operand.hbm [shape: bf16[512,512], index: 1, kind: input, shape index: {}]   ;;  %s1665_s2 = inlined_call_operand.hbm [shape: bf16[32,512], index: 2, kind: output, shape index: {}]  }
   0x1   :  { %8 = vsyncpa [#allocation7], 0 }
   0x2   :  { %10 = vsyncpa [#allocation7 + $0x1], 0 }
   0x3   :  { %11 = vsyncpa [#allocation5], 0 }
   0x4   :  { %13 = vsyncpa [#allocation5 + $0x1], 0  ;;  %s1409_s9 = smov 0   ;;  %s1411_s10 = smov 0  }
   0x5   :  { %s1413_s11 = smov 0   ;;  %s1415_s12 = smov 0  }
   0x6   :  { %s1417_s13 = smov 0   ;;  %s1419_s14 = smov 0  }
   0x7 LB: > { %s959_s15 = sadd.s32 4294967295, %s1384_s14   ;;  %s960_s16 = sadd.s32 4294967294, %s1384_s14   ;;  %s1384_s14 = sphi %s1419_s14, %s19_s14   ;;  %s1380_s13 = sphi %s1417_s13, %s1685_s13   ;;  %s1376_s12 = sphi %s1415_s12, %s1684_s12   ;;  %s1372_s11 = sphi %s1413_s11, %s1683_s11   ;;  %s1368_s10 = sphi %s1411_s10, %s1682_s10   ;;  %s1364_s9 = sphi %s1409_s9, %s1681_s9  }
   0x8   : > { %p88_p0 = scmp.ne.s32.totalorder %s1368_s10, %s1364_s9  ;;  %p1443_p1 = scmp.eq.s32.totalorder %s959_s15, 0 }
   0x9   : > { %p1447_p2 = scmp.eq.s32.totalorder %s959_s15, 1  ;;  %p120_p3 = scmp.eq.s32.totalorder %s960_s16, 1 }
   0xa   : > { %p1453_p4 = por %p1443_p1, %p88_p0  ;;  %p961_p5 = scmp.ge.s32.totalorder %s1384_s14, 1 }
   0xb   : > { %p1458_p6 = por %p120_p3, %p88_p0  ;;  %p127_p7 = scmp.lt.s32.totalorder %s1384_s14, 3 }
   0xc   : > { %s1670_s19 = scalar_select %p1453_p4, 1, 0 }
   0xd   : > { %s1671_s20 = scalar_select %p1458_p6, 1, 0 }
   0xe   : > { %p1463_p8 = pnand %p961_p5, %p127_p7  ;;  %s1386_s22 = smov [#allocation3]  }
   0xf   : > { %s145_s23 = sshll.u32 %s1386_s22, 4  ;;  %s34_s25 = sadd.s32 1, %s1380_s13  ;;  %s146_s23 = int_to_ptr.vmem [resolvable:$true] %s145_s23 }
  0x10   : > { %p1068_p9 = pneg %p1463_p8  ;;  %s1257_s26 = scalar_lea.vmem %s146_s23, 1024 }
  0x11   : > { %p1258_p13 = scmp.ne.s32.totalorder %s146_s23, %s1257_s26  ;;  %p1265_p5 = scmp.lt.s32.totalorder %s146_s23, %s146_s23 }
  0x12   : > { %p1472_p11 = pnand %p1068_p9, %p1443_p1  ;;  %p1266_p7 = scmp.lt.s32.totalorder %s1257_s26, %s1257_s26 }
  0x14   : > { %p1248_p12 = pneg %p1472_p11  ;;  %p1267_p6 = por %p1266_p7, %p1265_p5 }
  0x16   : > { %p1260_p0 = pnand %p1258_p13, %p1248_p12 }
  0x18   : > { %p1261_p3 = pneg %p1260_p0 }
  0x1a   : > { %p1268_p4 = pnand %p1267_p6, %p1261_p3 }
  0x1c   : > { %1271 = shalt.err (!%p1268_p4)
}
  0x1d   : > { %s1667_s27 = smov 256   ;;  %s1388_s28 = smov 16  }
  0x1e   : > { %1071 = dma.hbm_to_vmem [thread:$0]  (!%p1472_p11), %s1663_s0, 1024, %s146_s23, [#allocation4], %s1667_s27, %s1667_s27, %s1388_s28  }
  0x1f   : > { %p36_p4 = scmp.ge.s32.totalorder %s34_s25, 2  ;;  %s75_s3 = sadd.s32 1, %s1372_s11 }
  0x20   : > { %p82_p6 = scmp.ne.s32.totalorder %s1372_s11, %s1368_s10  ;;  %p83_p9 = scmp.eq.s32.totalorder %s1384_s14, 0 }
  0x21   : > { %s1687_s25 = smov (%p36_p4, %s34_s25), 0  ;;  %p1081_p0 = scmp.lt.s32.totalorder %s1384_s14, 2 }
  0x22   : > { %p1493_p12 = por %p83_p9, %p82_p6  ;;  %p1499_p13 = por %p1447_p2, %p82_p6 }
  0x23   : > { %s70_s6 = ssub.s32 %s1380_s13, %s1687_s25  ;;  %s159_s7 = sand.u32 1, %s1372_s11  }
  0x24   : > { %p73_p11 = scmp.eq.s32.totalorder %s70_s6, 0  ;;  %s964_s8 = sshll.u32 %s159_s7, 9 }
  0x25   : > { %s1054_s16 = sshll.u32 %s1380_s13, 13  ;;  %s163_s26 = scalar_lea.vmem [#allocation6], %s964_s8 }
  0x26   : > { %s1508_s15 = scalar_select %p73_p11, %s1372_s11, %s75_s3  }
  0x27   : > { %s172_s24 = scalar_lea.hbm %s1664_s1, %s1054_s16  ;;  %s173_s29 = sshll.u32 %s163_s26, 4  ;;  %s174_s29 = int_to_ptr.vmem [resolvable:$true] %s173_s29 }
  0x28   : > { %p1516_p2 = pnand %p1081_p0, %p1493_p12  ;;  %s160_s30 = scalar_lea.sflag [#allocation7], %s159_s7 }
  0x29   : > { %s1285_s6 = scalar_lea.vmem %s174_s29, 8192  ;;  %s1389_s3 = smov [#allocation6]  }
  0x2a   : > { %p1274_p3 = pneg %p1516_p2  ;;  %p1286_p5 = scmp.ne.s32.totalorder %s174_s29, %s1285_s6 }
  0x2b   : > { %s1290_s27 = sshll.u32 %s1389_s3, 4  ;;  %s1291_s27 = int_to_ptr.vmem [resolvable:$false] %s1290_s27 }
  0x2c   : > { %p1288_p7 = pnand %p1286_p5, %p1274_p3  ;;  %s1292_s16 = scalar_lea.vmem %s1291_s27, 16384 }
  0x2d   : > { %p1293_p6 = scmp.lt.s32.totalorder %s174_s29, %s1291_s27  ;;  %p1294_p9 = scmp.lt.s32.totalorder %s1292_s16, %s1285_s6 }
  0x2e   : > { %p1289_p4 = pneg %p1288_p7 }
  0x2f   : > { %p1295_p11 = por %p1294_p9, %p1293_p6 }
  0x31   : > { %p1296_p10 = pnand %p1295_p11, %p1289_p4 }
  0x33   : > { %1299 = shalt.err (!%p1296_p10)
}
  0x34   : > { %s1677_s4 = smov 256   ;;  %185 = sbr.rel (%p1463_p8) target bundleno = 417 (0x1a1), region = 28 }
  0x35   : > { %1075 = dma.hbm_to_vmem [thread:$0]  (!%p1516_p2), %s172_s24, 8192, %s174_s29, %s160_s30, %s1677_s4, %s1677_s4, %s1388_s28  }
  0x39   : > { %1351 = dma.done.wait (%p1443_p1), [#allocation4], 1024  }
  0x3a   : > { %1353 = vsyncadd (%p1443_p1), [#allocation4], 4294966272  ;;  %s1534_s27 = sand.u32 1, %s1368_s10   ;;  %p1678_p10 = scmp.ne.s32.totalorder %s1670_s19, 0 }
  0x3b   : > { %s970_s7 = sshll.u32 %s1534_s27, 9  ;;  %s192_s8 = scalar_lea.sflag [#allocation7], %s1534_s27 }
  0x3c   : > { %s1538_s22 = scalar_lea.vmem [#allocation6], %s970_s7 }
  0x3d   : > { %1355 = dma.done.wait (%p1678_p10), %s192_s8, 8192  }
  0x3e   : > { %1357 = vsyncadd (%p1678_p10), %s192_s8, 4294959104  ;;  %v1138_v0 = vld [vmem:[%s1538_s22 + $0xe4] ss:$16 sps:$4 sm:$0xff]   ;;  %v1140_v1 = vld [vmem:[%s1538_s22 + $0xec] ss:$16 sps:$4 sm:$0xff]   ;;  %s971_s17 = sshll.u32 %s1534_s27, 5 }
  0x3f   : > { %674 = vmatprep.subr.bf16.mxu0 %v1138_v0  ;;  %v1142_v2 = vld [vmem:[%s1538_s22 + $0xe0] ss:$16 sps:$4 sm:$0xff]   ;;  %v1143_v3 = vld [vmem:[%s1538_s22 + $0xe8] ss:$16 sps:$4 sm:$0xff]   ;;  %727 = vmatprep.subr.bf16.mxu1 %v1140_v1  ;;  %v1144_v4 = vld [vmem:[%s1538_s22 + $0xc4] ss:$16 sps:$4 sm:$0xff]  }
  0x40   : > { %675 = vmatpush1.bf16.xpose.msra.mxu0 %v1142_v2  ;;  %728 = vmatpush1.bf16.xpose.msra.mxu1 %v1143_v3  ;;  %v1146_v5 = vld [vmem:[%s1538_s22 + $0xcc] ss:$16 sps:$4 sm:$0xff]   ;;  %v1148_v6 = vld [vmem:[%s1538_s22 + $0xc0] ss:$16 sps:$4 sm:$0xff]   ;;  %v1149_v7 = vld [vmem:[%s1538_s22 + $0xc8] ss:$16 sps:$4 sm:$0xff]  }
  0x41   : > { %676 = vmatprep.subr.bf16.mxu0 %v1144_v4  ;;  %729 = vmatprep.subr.bf16.mxu1 %v1146_v5  ;;  %v1150_v8 = vld [vmem:[%s1538_s22 + $0xa4] ss:$16 sps:$4 sm:$0xff]   ;;  %v1152_v9 = vld [vmem:[%s1538_s22 + $0xac] ss:$16 sps:$4 sm:$0xff]   ;;  %v1154_v10 = vld [vmem:[%s1538_s22 + $0xa0] ss:$16 sps:$4 sm:$0xff]  }
  0x42   : > { %v1155_v11 = vld [vmem:[%s1538_s22 + $0xa8] ss:$16 sps:$4 sm:$0xff]   ;;  %v1156_v12 = vld [vmem:[%s1538_s22 + $0x84] ss:$16 sps:$4 sm:$0xff]   ;;  %v1158_v13 = vld [vmem:[%s1538_s22 + $0x8c] ss:$16 sps:$4 sm:$0xff]  }
  0x43   : > { %v1160_v14 = vld [vmem:[%s1538_s22 + $0x80] ss:$16 sps:$4 sm:$0xff]   ;;  %v1161_v15 = vld [vmem:[%s1538_s22 + $0x88] ss:$16 sps:$4 sm:$0xff]   ;;  %v1162_v16 = vld [vmem:[%s1538_s22 + $0x64] ss:$16 sps:$4 sm:$0xff]  }
  0x44   : > { %v1164_v17 = vld [vmem:[%s1538_s22 + $0x6c] ss:$16 sps:$4 sm:$0xff]   ;;  %v1166_v18 = vld [vmem:[%s1538_s22 + $0x60] ss:$16 sps:$4 sm:$0xff]   ;;  %v1167_v19 = vld [vmem:[%s1538_s22 + $0x68] ss:$16 sps:$4 sm:$0xff]  }
  0x45   : > { %v1168_v20 = vld [vmem:[%s1538_s22 + $0x44] ss:$16 sps:$4 sm:$0xff]   ;;  %v1170_v21 = vld [vmem:[%s1538_s22 + $0x4c] ss:$16 sps:$4 sm:$0xff]   ;;  %v1172_v22 = vld [vmem:[%s1538_s22 + $0x40] ss:$16 sps:$4 sm:$0xff]  }
  0x46   : > { %v1173_v23 = vld [vmem:[%s1538_s22 + $0x48] ss:$16 sps:$4 sm:$0xff]   ;;  %v1174_v24 = vld [vmem:[%s1538_s22 + $0x24] ss:$16 sps:$4 sm:$0xff]   ;;  %v1176_v25 = vld [vmem:[%s1538_s22 + $0x2c] ss:$16 sps:$4 sm:$0xff]  }
  0x47   : > { %v1236_v26 = vld [vmem:[#allocation3 + $0x4] ss:$16 sps:$4 sm:$0xff]   ;;  %v1239_v27 = vld [vmem:[#allocation3 + $0xc] ss:$16 sps:$4 sm:$0xff]   ;;  %v1178_v28 = vld [vmem:[%s1538_s22 + $0x20] ss:$16 sps:$4 sm:$0xff]  }
  0x48   : > { %677 = vmatpush1.bf16.xpose.msra.mxu0 %v1148_v6  ;;  %730 = vmatpush1.bf16.xpose.msra.mxu1 %v1149_v7  ;;  %v1179_v29 = vld [vmem:[%s1538_s22 + $0x28] ss:$16 sps:$4 sm:$0xff]   ;;  %v1180_v30 = vld [vmem:[%s1538_s22 + $0x4] ss:$16 sps:$4 sm:$0xff]   ;;  %v1182_v31 = vld [vmem:[%s1538_s22 + $0xc] ss:$16 sps:$4 sm:$0xff]  }
  0x49   : > { %678 = vmatprep.subr.bf16.mxu0 %v1150_v8  ;;  %731 = vmatprep.subr.bf16.mxu1 %v1152_v9  ;;  %v1184_v32 = vld [vmem:[%s1538_s22] ss:$16 sps:$4 sm:$0xff]   ;;  %v1185_v33 = vld [vmem:[%s1538_s22 + $0x8] ss:$16 sps:$4 sm:$0xff]   ;;  %v1186_v34 = vld [vmem:[%s1538_s22 + $0x1e4] ss:$16 sps:$4 sm:$0xff]  }
  0x4a   : > { %706 = vmatprep.mubr.bf16.mxu0 %v1236_v26  ;;  %759 = vmatprep.mubr.bf16.mxu1 %v1239_v27  ;;  %v1188_v35 = vld [vmem:[%s1538_s22 + $0x1ec] ss:$16 sps:$4 sm:$0xff]   ;;  %v1190_v36 = vld [vmem:[%s1538_s22 + $0x1e0] ss:$16 sps:$4 sm:$0xff]   ;;  %v1191_v37 = vld [vmem:[%s1538_s22 + $0x1e8] ss:$16 sps:$4 sm:$0xff]  }
  0x4b   : > { %v1192_v38 = vld [vmem:[%s1538_s22 + $0x1c4] ss:$16 sps:$4 sm:$0xff]   ;;  %v1194_v39 = vld [vmem:[%s1538_s22 + $0x1cc] ss:$16 sps:$4 sm:$0xff]   ;;  %v1196_v40 = vld [vmem:[%s1538_s22 + $0x1c0] ss:$16 sps:$4 sm:$0xff]  }
  0x4c   : > { %v1197_v41 = vld [vmem:[%s1538_s22 + $0x1c8] ss:$16 sps:$4 sm:$0xff]   ;;  %v1198_v42 = vld [vmem:[%s1538_s22 + $0x1a4] ss:$16 sps:$4 sm:$0xff]   ;;  %v1200_v43 = vld [vmem:[%s1538_s22 + $0x1ac] ss:$16 sps:$4 sm:$0xff]  }
  0x4d   : > { %v1202_v44 = vld [vmem:[%s1538_s22 + $0x1a0] ss:$16 sps:$4 sm:$0xff]   ;;  %v1203_v45 = vld [vmem:[%s1538_s22 + $0x1a8] ss:$16 sps:$4 sm:$0xff]   ;;  %v1204_v46 = vld [vmem:[%s1538_s22 + $0x184] ss:$16 sps:$4 sm:$0xff]  }
  0x4e   : > { %v1206_v47 = vld [vmem:[%s1538_s22 + $0x18c] ss:$16 sps:$4 sm:$0xff]   ;;  %v1208_v48 = vld [vmem:[%s1538_s22 + $0x180] ss:$16 sps:$4 sm:$0xff]   ;;  %v1209_v49 = vld [vmem:[%s1538_s22 + $0x188] ss:$16 sps:$4 sm:$0xff]  }
  0x4f   : > { %v1210_v50 = vld [vmem:[%s1538_s22 + $0x164] ss:$16 sps:$4 sm:$0xff]   ;;  %v1212_v51 = vld [vmem:[%s1538_s22 + $0x16c] ss:$16 sps:$4 sm:$0xff]   ;;  %v1214_v52 = vld [vmem:[%s1538_s22 + $0x160] ss:$16 sps:$4 sm:$0xff]  }
  0x50   : > { %679 = vmatpush1.bf16.xpose.msra.mxu0 %v1154_v10  ;;  %732 = vmatpush1.bf16.xpose.msra.mxu1 %v1155_v11  ;;  %v1215_v53 = vld [vmem:[%s1538_s22 + $0x168] ss:$16 sps:$4 sm:$0xff]   ;;  %v1216_v54 = vld [vmem:[%s1538_s22 + $0x144] ss:$16 sps:$4 sm:$0xff]   ;;  %v1218_v55 = vld [vmem:[%s1538_s22 + $0x14c] ss:$16 sps:$4 sm:$0xff]  }
  0x51   : > { %680 = vmatprep.subr.bf16.mxu0 %v1156_v12  ;;  %733 = vmatprep.subr.bf16.mxu1 %v1158_v13  ;;  %v1220_v56 = vld [vmem:[%s1538_s22 + $0x140] ss:$16 sps:$4 sm:$0xff]   ;;  %v1221_v57 = vld [vmem:[%s1538_s22 + $0x148] ss:$16 sps:$4 sm:$0xff]   ;;  %v1222_v58 = vld [vmem:[%s1538_s22 + $0x124] ss:$16 sps:$4 sm:$0xff]  }
  0x52   : > { %v1224_v59 = vld [vmem:[%s1538_s22 + $0x12c] ss:$16 sps:$4 sm:$0xff]   ;;  %v1226_v60 = vld [vmem:[%s1538_s22 + $0x120] ss:$16 sps:$4 sm:$0xff]   ;;  %v1227_v61 = vld [vmem:[%s1538_s22 + $0x128] ss:$16 sps:$4 sm:$0xff]  }
  0x53   : > { %v1228_v62 = vld [vmem:[%s1538_s22 + $0x104] ss:$16 sps:$4 sm:$0xff]   ;;  %v1230_v63 = vld [vmem:[%s1538_s22 + $0x10c] ss:$16 sps:$4 sm:$0xff]   ;;  %v1232_v0 = vld [vmem:[%s1538_s22 + $0x100] ss:$16 sps:$4 sm:$0xff]  }
  0x54   : > { %v1233_v1 = vld [vmem:[%s1538_s22 + $0x108] ss:$16 sps:$4 sm:$0xff]   ;;  %v1234_v2 = vld [vmem:[#allocation3] ss:$16 sps:$4 sm:$0xff]   ;;  %v1240_v4 = vld [vmem:[#allocation3 + $0x24] ss:$16 sps:$4 sm:$0xff]  }
  0x55   : > { %v1237_v3 = vld [vmem:[#allocation3 + $0x8] ss:$16 sps:$4 sm:$0xff]   ;;  %v1242_v5 = vld [vmem:[#allocation3 + $0x2c] ss:$16 sps:$4 sm:$0xff]   ;;  %v1244_v6 = vld [vmem:[#allocation3 + $0x20] ss:$16 sps:$4 sm:$0xff]  }
  0x56   : > { %v1245_v7 = vld [vmem:[#allocation3 + $0x28] ss:$16 sps:$4 sm:$0xff]   ;;  %s215_s19 = scalar_lea.vmem [#allocation8], %s971_s17  ;;  %s1059_s28 = sshll.u32 %s1376_s12, 7 }
  0x57   : > { %s852_s21 = sshll.u32 %s215_s19, 4  ;;  %s1615_s26 = scalar_lea.hbm %s1665_s2, %s1059_s28  ;;  %s1610_s21 = int_to_ptr.vmem [resolvable:$true] %s852_s21 }
  0x58   : > { %681 = vmatpush1.bf16.xpose.msra.mxu0 %v1160_v14  ;;  %734 = vmatpush1.bf16.xpose.msra.mxu1 %v1161_v15  ;;  %s836_s29 = scalar_lea.sflag [#allocation5], %s1534_s27  ;;  %s1300_s18 = scalar_lea.vmem %s1610_s21, 512 }
  0x59   : > { %682 = vmatprep.subr.bf16.mxu0 %v1162_v16  ;;  %735 = vmatprep.subr.bf16.mxu1 %v1164_v17  ;;  %p1301_p1 = scmp.ne.s32.totalorder %s1610_s21, %s1300_s18  ;;  %s1390_s12 = smov [#allocation8]  }
  0x5a   : > { %s1304_s30 = sshll.u32 %s1390_s12, 4  ;;  %s1305_s30 = int_to_ptr.vmem [resolvable:$false] %s1304_s30 }
  0x5b   : > { %p1302_p8 = pnand %p1301_p1, %p1499_p13  ;;  %s1306_s6 = scalar_lea.vmem %s1305_s30, 1024 }
  0x5c   : > { %p1307_p0 = scmp.lt.s32.totalorder %s1610_s21, %s1305_s30  ;;  %p1308_p2 = scmp.lt.s32.totalorder %s1306_s6, %s1300_s18 }
  0x5d   : > { %p1303_p12 = pneg %p1302_p8 }
  0x5e   : > { %p1309_p3 = por %p1308_p2, %p1307_p0 }
  0x60   : > { %683 = vmatpush1.bf16.xpose.msra.mxu0 %v1166_v18  ;;  %736 = vmatpush1.bf16.xpose.msra.mxu1 %v1167_v19  ;;  %p1310_p5 = pnand %p1309_p3, %p1303_p12 }
  0x61   : > { %684 = vmatprep.subr.bf16.mxu0 %v1168_v20  ;;  %737 = vmatprep.subr.bf16.mxu1 %v1170_v21 }
  0x68   : > { %685 = vmatpush1.bf16.xpose.msra.mxu0 %v1172_v22  ;;  %738 = vmatpush1.bf16.xpose.msra.mxu1 %v1173_v23 }
  0x69   : > { %686 = vmatprep.subr.bf16.mxu0 %v1174_v24  ;;  %739 = vmatprep.subr.bf16.mxu1 %v1176_v25 }
  0x70   : > { %687 = vmatpush1.bf16.xpose.msra.mxu0 %v1178_v28  ;;  %740 = vmatpush1.bf16.xpose.msra.mxu1 %v1179_v29 }
  0x71   : > { %688 = vmatprep.subr.bf16.mxu0 %v1180_v30  ;;  %741 = vmatprep.subr.bf16.mxu1 %v1182_v31 }
  0x78   : > { %689 = vmatpush1.bf16.xpose.msra.mxu0 %v1184_v32  ;;  %742 = vmatpush1.bf16.xpose.msra.mxu1 %v1185_v33 }
  0x79   : > { %690 = vmatprep.subr.bf16.mxu0 %v1186_v34  ;;  %743 = vmatprep.subr.bf16.mxu1 %v1188_v35 }
  0x80   : > { %691 = vmatpush2.bf16.xpose.msra.mxu0 %v1190_v36  ;;  %744 = vmatpush2.bf16.xpose.msra.mxu1 %v1191_v37 }
  0x81   : > { %692 = vmatprep.subr.bf16.mxu0 %v1192_v38  ;;  %745 = vmatprep.subr.bf16.mxu1 %v1194_v39 }
  0x88   : > { %693 = vmatpush2.bf16.xpose.msra.mxu0 %v1196_v40  ;;  %746 = vmatpush2.bf16.xpose.msra.mxu1 %v1197_v41 }
  0x89   : > { %694 = vmatprep.subr.bf16.mxu0 %v1198_v42  ;;  %747 = vmatprep.subr.bf16.mxu1 %v1200_v43 }
  0x90   : > { %695 = vmatpush2.bf16.xpose.msra.mxu0 %v1202_v44  ;;  %748 = vmatpush2.bf16.xpose.msra.mxu1 %v1203_v45 }
  0x91   : > { %696 = vmatprep.subr.bf16.mxu0 %v1204_v46  ;;  %749 = vmatprep.subr.bf16.mxu1 %v1206_v47 }
  0x98   : > { %697 = vmatpush2.bf16.xpose.msra.mxu0 %v1208_v48  ;;  %750 = vmatpush2.bf16.xpose.msra.mxu1 %v1209_v49 }
  0x99   : > { %698 = vmatprep.subr.bf16.mxu0 %v1210_v50  ;;  %751 = vmatprep.subr.bf16.mxu1 %v1212_v51 }
  0xa0   : > { %699 = vmatpush2.bf16.xpose.msra.mxu0 %v1214_v52  ;;  %752 = vmatpush2.bf16.xpose.msra.mxu1 %v1215_v53 }
  0xa1   : > { %700 = vmatprep.subr.bf16.mxu0 %v1216_v54  ;;  %753 = vmatprep.subr.bf16.mxu1 %v1218_v55 }
  0xa8   : > { %701 = vmatpush2.bf16.xpose.msra.mxu0 %v1220_v56  ;;  %754 = vmatpush2.bf16.xpose.msra.mxu1 %v1221_v57 }
  0xa9   : > { %702 = vmatprep.subr.bf16.mxu0 %v1222_v58  ;;  %755 = vmatprep.subr.bf16.mxu1 %v1224_v59 }
  0xb0   : > { %703 = vmatpush2.bf16.xpose.msra.mxu0 %v1226_v60  ;;  %756 = vmatpush2.bf16.xpose.msra.mxu1 %v1227_v61 }
  0xb1   : > { %704 = vmatprep.subr.bf16.mxu0 %v1228_v62  ;;  %757 = vmatprep.subr.bf16.mxu1 %v1230_v63 }
  0xb8   : > { %705 = vmatpush2.bf16.xpose.msra.mxu0 %v1232_v0  ;;  %758 = vmatpush2.bf16.xpose.msra.mxu1 %v1233_v1 }
  0xbf   : > { %707 = vmatmul.mubr.bf16.vlgmr.msra.gmra.mxu0 %v1234_v2  ;;  %760 = vmatmul.mubr.bf16.vlgmr.msra.gmra.mxu1 %v1237_v3 }
  0xc0   : > { %716 = vmatprep.mubr.bf16.mxu0 %v1240_v4  ;;  %769 = vmatprep.mubr.bf16.mxu1 %v1242_v5 }
  0xc7   : > { %717 = vmatmul.mubr.bf16.gmra.mxu0 %v1244_v6  ;;  %770 = vmatmul.mubr.bf16.gmra.mxu1 %v1245_v7 }
 0x17f   : > { %v708_v8 = vpop.f32.mrf.mxu0  ;;  %v761_v9 = vpop.f32.mrf.mxu1 }
 0x180   : > { %v762_v12 = vadd.f32 %v761_v9, %v708_v8 }
 0x181   : > { %v710_v10 = vpop.f32.mrf.mxu0  ;;  %v763_v11 = vpop.f32.mrf.mxu1 }
 0x182   : > { %v764_v13 = vadd.f32 %v763_v11, %v710_v10 }
 0x183   : > { %v712_v14 = vpop.f32.mrf.mxu0  ;;  %v765_v15 = vpop.f32.mrf.mxu1 }
 0x184   : > { %v1055_v16 = vpack.c.bf16 %v764_v13, %v762_v12  ;;  %v766_v19 = vadd.f32 %v765_v15, %v712_v14 }
 0x185   : > { %v714_v17 = vpop.f32.mrf.mxu0  ;;  %v767_v18 = vpop.f32.mrf.mxu1 }
 0x186   : > { %831 = vst [vmem:[%s215_s19] sm:$0xff] %v1055_v16  ;;  %v768_v20 = vadd.f32 %v767_v18, %v714_v17 }
 0x187   : > { %v718_v21 = vpop.f32.mrf.mxu0  ;;  %v771_v22 = vpop.f32.mrf.mxu1 }
 0x188   : > { %v1056_v23 = vpack.c.bf16 %v768_v20, %v766_v19  ;;  %v772_v26 = vadd.f32 %v771_v22, %v718_v21 }
 0x189   : > { %v720_v24 = vpop.f32.mrf.mxu0  ;;  %v773_v25 = vpop.f32.mrf.mxu1 }
 0x18a   : > { %832 = vst [vmem:[%s215_s19 + $0x8] sm:$0xff] %v1056_v23  ;;  %v774_v27 = vadd.f32 %v773_v25, %v720_v24 }
 0x18b   : > { %v722_v28 = vpop.f32.mrf.mxu0  ;;  %v775_v29 = vpop.f32.mrf.mxu1 }
 0x18c   : > { %v1057_v30 = vpack.c.bf16 %v774_v27, %v772_v26  ;;  %v776_v33 = vadd.f32 %v775_v29, %v722_v28 }
 0x18d   : > { %v724_v31 = vpop.f32.mrf.mxu0  ;;  %v777_v32 = vpop.f32.mrf.mxu1 }
 0x18e   : > { %833 = vst [vmem:[%s215_s19 + $0x10] sm:$0xff] %v1057_v30  ;;  %v778_v34 = vadd.f32 %v777_v32, %v724_v31 }
 0x190   : > { %v1058_v35 = vpack.c.bf16 %v778_v34, %v776_v33 }
 0x192   : > { %834 = vst [vmem:[%s215_s19 + $0x18] sm:$0xff] %v1058_v35 }
 0x193   : > { %1313 = shalt.err (!%p1310_p5)
}
 0x194   : > { %s1314_s3 = scalar_lea.hbm %s1615_s26, 512  ;;  %s1318_s7 = scalar_lea.hbm %s1665_s2, 1024 }
 0x195   : > { %p1315_p7 = scmp.ne.s32.totalorder %s1615_s26, %s1314_s3  ;;  %p1319_p9 = scmp.lt.s32.totalorder %s1615_s26, %s1665_s2 }
 0x196   : > { %p1320_p11 = scmp.lt.s32.totalorder %s1318_s7, %s1314_s3 }
 0x197   : > { %p1316_p4 = pnand %p1315_p7, %p1499_p13 }
 0x198   : > { %p1321_p10 = por %p1320_p11, %p1319_p9 }
 0x199   : > { %p1317_p6 = pneg %p1316_p4 }
 0x19b   : > { %p1322_p1 = pnand %p1321_p10, %p1317_p6 }
 0x19d   : > { %1325 = shalt.err (!%p1322_p1)
}
 0x19e   : > { %s1391_s17 = smov 128   ;;  %s1392_s19 = smov 256  }
 0x19f   : > { %s1393_s28 = smov 8  }
 0x1a0   : > { %1066 = dma.vmem_to_hbm [thread:$0]  (%p1499_p13), %s1610_s21, 512, %s1615_s26, %s836_s29, %s1391_s17, %s1392_s19, %s1393_s28  }
 0x1a1 PF: > { %s867_s23 = sand.u32 1, %s1364_s9   ;;  %p1679_p8 = scmp.ne.s32.totalorder %s1671_s20, 0 }
 0x1a2   : > { %p1680_p12 = scmp.ge.s32.totalorder %s1384_s14, 2  ;;  %s868_s24 = scalar_lea.sflag [#allocation5], %s867_s23 }
 0x1a4   : > { %p1077_p0 = pnand %p1680_p12, %p1679_p8 }
 0x1a6   : > { %p1078_p2 = pneg %p1077_p0 }
 0x1a8   : > { %1359 = dma.done.wait (%p1078_p2), %s868_s24, 512  }
 0x1a9   : > { %1361 = vsyncadd (%p1078_p2), %s868_s24, 4294966784  ;;  %s19_s14 = sadd.s32 1, %s1384_s14   ;;  %s1681_s9 = smov %s1368_s10 }
 0x1aa   : > { %p16_p3 = scmp.ge.s32.totalorder %s19_s14, 4   ;;  %s1682_s10 = smov %s1372_s11 }
 0x1ab   : > { %s1683_s11 = smov %s1508_s15  ;;  %s1684_s12 = smov %s1380_s13 }
 0x1ac   : > { %s1685_s13 = smov %s1687_s25  ;;  %18 = sbr.rel (!%p16_p3) target bundleno = 7 (0x7), region = 87 }
 0x1b1   :  { %873 = vsyncpa [#allocation4], 1 }
 0x1b2   :  { %875 = vsyncpa [#allocation4 + $0x1], 1 }
 0x1b3   :  { %876 = vsyncpa [#allocation7], 1 }
 0x1b4   :  { %878 = vsyncpa [#allocation7 + $0x1], 1 }
 0x1b5   :  { %879 = vsyncpa [#allocation5], 1 }
 0x1b6   :  { %881 = vsyncpa [#allocation5 + $0x1], 1 }

</bundles_post_ra>
